<compile_context>
chip_gen: v7x
topology: tpu7x:2x2x1
jax: 0.10.0
libtpu: 0.0.40
codegen_flags: <defaults>
</compile_context>

<pallas_src>
import functools

import jax
import jax.numpy as jnp
from jax.experimental import pallas as pl
from jax.experimental.pallas import tpu as pltpu

BN_EPS = 1e-5
NUM_HIDDEN = 5


# ---------------------------------------------------------------------------
# Kernel
# ---------------------------------------------------------------------------
def affine_coupling_kernel(xp_ref, slab_ref, out_ref, *, a_size, i_size):
    """Inputs:
        xp_ref  : [B, O]          permuted input (x[..., perm]); lanes [0,A) = x_a,
                                  lanes [A,O) = x_b
        slab_ref: [7I+12, C]      packed parameters, C = max(I, A):
                    rows [0, 5I)        : 5 hidden Linear weights [I, I] ([in, out])
                    rows [5I, 6I)       : W_s [I, A]
                    rows [6I, 7I)       : W_t [I, A]
                    rows [7I, 7I+5)     : BN gamma, one row per layer [1, I]
                    rows [7I+5, 7I+10)  : BN beta,  one row per layer [1, I]
                    row  7I+10          : b_s [1, A]
                    row  7I+11          : b_t [1, A]
       Output:
        out_ref : [B, O]          concat([exp(s)*x_a + t, x_b], -1)
    """
    A, I = a_size, i_size
    n = xp_ref.shape[0]
    inv_n = 1.0 / n

    xp = xp_ref[...]            # [B, O]
    x_a = xp[:, :A]             # [B, A]
    x_b = xp[:, A:]             # [B, I]

    g_base = (NUM_HIDDEN + 2) * I          # start of gamma block
    b_base = g_base + 2 * NUM_HIDDEN       # b_s / b_t rows

    h = x_b
    for li in range(NUM_HIDDEN):           # static unroll; all slices static
        w = slab_ref[li * I:(li + 1) * I, :I]                              # [I, I]
        g = slab_ref[g_base + li:g_base + li + 1, :I]                      # [1, I]
        be = slab_ref[g_base + NUM_HIDDEN + li:
                      g_base + NUM_HIDDEN + li + 1, :I]                    # [1, I]

        # Linear.  Bias omitted: a pre-BN per-feature constant is exactly cancelled
        # by the batch-mean subtraction below.
        h = jnp.dot(h, w, preferred_element_type=jnp.float32)

        # BatchNorm1d, training mode (biased batch variance, eps=1e-5).
        # Single reduction pass: sum and sum-of-squares together; clamp the
        # one-pass variance against catastrophic cancellation.
        s1 = jnp.sum(h, axis=0, keepdims=True)
        s2 = jnp.sum(h * h, axis=0, keepdims=True)
        mean = s1 * inv_n
        var = jnp.maximum(s2 * inv_n - mean * mean, 0.0)
        h = (h - mean) * (g * jax.lax.rsqrt(var + BN_EPS)) + be

        # Sigmoid via tanh -> EUP slot (avoids a VALU f32 divide).
        h = 0.5 * jnp.tanh(0.5 * h) + 0.5

    # Final projection, pre-split halves: two tiny MXU pushes instead of an
    # in-lane slice of a [B, 2A] result at column A.
    w_s = slab_ref[NUM_HIDDEN * I:(NUM_HIDDEN + 1) * I, :A]
    w_t = slab_ref[(NUM_HIDDEN + 1) * I:(NUM_HIDDEN + 2) * I, :A]
    b_s = slab_ref[b_base:b_base + 1, :A]
    b_t = slab_ref[b_base + 1:b_base + 2, :A]

    s = jnp.dot(h, w_s, preferred_element_type=jnp.float32) + b_s
    t = jnp.dot(h, w_t, preferred_element_type=jnp.float32) + b_t

    y_a = jnp.exp(s) * x_a + t
    out_ref[...] = jnp.concatenate([y_a, x_b], axis=-1).astype(out_ref.dtype)


# ---------------------------------------------------------------------------
# Parameters & packing
# ---------------------------------------------------------------------------
def init_params(key, output_size, intermediate_size):
    """Deterministic synthetic parameters (shapes match the PyTorch module).

    Weights are stored in [in, out] layout (i.e. PyTorch weight.T).
    Returns a flat list of 22 arrays: 5 x (W, b, gamma, beta) + (W_last, b_last),
    plus the feature permutation.
    """
    I = intermediate_size
    A = output_size - intermediate_size
    params = []
    for _ in range(NUM_HIDDEN):
        key, k_w, k_b, k_g, k_be = jax.random.split(key, 5)
        w = jax.random.normal(k_w, (I, I), jnp.float32) * 0.3
        b = jax.random.normal(k_b, (1, I), jnp.float32) * 0.1
        gamma = 1.0 + 0.1 * jax.random.normal(k_g, (1, I), jnp.float32)
        beta = 0.1 * jax.random.normal(k_be, (1, I), jnp.float32)
        params += [w, b, gamma, beta]
    key, k_w, k_b = jax.random.split(key, 3)
    w_last = jax.random.normal(k_w, (I, 2 * A), jnp.float32) * 0.3
    b_last = jax.random.normal(k_b, (1, 2 * A), jnp.float32) * 0.1
    params += [w_last, b_last]
    key, k_perm = jax.random.split(key)
    perm = jax.random.permutation(k_perm, output_size)
    return params, perm


def _pack_params(params, i_size, a_size):
    """Pack everything into ONE [7I+12, max(I,A)] slab (2 kernel DMAs total).

    Hidden Linear biases (params[4i+1]) are intentionally not packed: they are
    cancelled by the training-mode BatchNorm mean subtraction.
    """
    I, A = i_size, a_size
    C = max(I, A)

    def pad_lanes(m):
        return jnp.pad(m, ((0, 0), (0, C - m.shape[1])))

    rows = []
    for li in range(NUM_HIDDEN):
        rows.append(pad_lanes(params[4 * li]))                 # W  [I, I]
    w_last, b_last = params[4 * NUM_HIDDEN], params[4 * NUM_HIDDEN + 1]
    rows.append(pad_lanes(w_last[:, :A]))                      # W_s [I, A]
    rows.append(pad_lanes(w_last[:, A:]))                      # W_t [I, A]
    for li in range(NUM_HIDDEN):
        rows.append(pad_lanes(params[4 * li + 2]))             # gamma [1, I]
    for li in range(NUM_HIDDEN):
        rows.append(pad_lanes(params[4 * li + 3]))             # beta  [1, I]
    rows.append(pad_lanes(b_last[:, :A]))                      # b_s [1, A]
    rows.append(pad_lanes(b_last[:, A:]))                      # b_t [1, A]
    return jnp.concatenate(rows, axis=0)                       # [7I+12, C]


# ---------------------------------------------------------------------------
# Wrapper
# ---------------------------------------------------------------------------
@functools.partial(jax.jit, static_argnames=("output_size", "intermediate_size"))
def affine_coupling_forward(x, perm, params, *, output_size, intermediate_size):
    B = x.shape[0]
    O = output_size
    I = intermediate_size
    A = O - I

    # Glue reduced to a single gather; split + concat now live inside the kernel.
    xp = jnp.take(x, perm, axis=-1)

    slab = _pack_params(params, I, A)

    flops = 2 * B * I * (NUM_HIDDEN * I + 2 * A) + 12 * NUM_HIDDEN * B * I + 4 * B * A
    transcendentals = B * (NUM_HIDDEN * I + A)
    bytes_accessed = 4 * (2 * B * O + slab.shape[0] * slab.shape[1])

    vmem = pl.BlockSpec(memory_space=pltpu.MemorySpace.VMEM)
    return pl.pallas_call(
        functools.partial(affine_coupling_kernel, a_size=A, i_size=I),
        out_shape=jax.ShapeDtypeStruct((B, O), jnp.float32),
        in_specs=[vmem, vmem],
        out_specs=vmem,
        cost_estimate=pl.CostEstimate(
            flops=flops,
            transcendentals=transcendentals,
            bytes_accessed=bytes_accessed),
    )(xp, slab)


# ---------------------------------------------------------------------------
# Pure-JAX reference (mirrors the PyTorch module, training-mode BN, exact sigmoid)
# ---------------------------------------------------------------------------
def reference_forward(x, perm, params, *, output_size, intermediate_size):
    A = output_size - intermediate_size
    xp = jnp.take(x, perm, axis=-1)
    x_a, x_b = xp[:, :A], xp[:, A:]
    h = x_b
    idx = 0
    for _ in range(NUM_HIDDEN):
        w, b, g, be = params[idx], params[idx + 1], params[idx + 2], params[idx + 3]
        idx += 4
        h = h @ w + b
        mean = jnp.mean(h, axis=0, keepdims=True)
        var = jnp.mean((h - mean) ** 2, axis=0, keepdims=True)
        h = (h - mean) / jnp.sqrt(var + BN_EPS) * g + be
        h = jax.nn.sigmoid(h)
    st = h @ params[idx] + params[idx + 1]
    s, t = st[:, :A], st[:, A:]
    y_a = jnp.exp(s) * x_a + t
    return jnp.concatenate([y_a, x_b], axis=-1)


if __name__ == "__main__":
    OUTPUT_SIZE = 16
    INTERMEDIATE_SIZE = 8
    BATCH = 8

    key = jax.random.PRNGKey(0)
    key, k_x = jax.random.split(key)
    x = jax.random.normal(k_x, (BATCH, OUTPUT_SIZE), jnp.float32)

    params, perm = init_params(key, OUTPUT_SIZE, INTERMEDIATE_SIZE)

    y = affine_coupling_forward(
        x, perm, params,
        output_size=OUTPUT_SIZE, intermediate_size=INTERMEDIATE_SIZE)
    y = jax.block_until_ready(y)

    y_ref = reference_forward(
        x, perm, params,
        output_size=OUTPUT_SIZE, intermediate_size=INTERMEDIATE_SIZE)

    assert y.shape == (BATCH, OUTPUT_SIZE)
    # Kernel uses tanh-form sigmoid, one-pass clamped BN variance, and drops the
    # (mathematically cancelled) pre-BN Linear bias; few-ulp, generation-dependent
    # deviations compound over 5 layers -> 5e-4 tolerance.
    assert jnp.allclose(y, y_ref, atol=5e-4, rtol=5e-4), (
        float(jnp.max(jnp.abs(y - y_ref))))

    print("KERNEL_OK")
</pallas_src>

<mosaic_0001>
module attributes {stable_mosaic.version = 11 : i64} {
  func.func @affine_coupling_kernel(%arg0: memref<8x16xf32, #tpu.memory_space<vmem>>, %arg1: memref<68x8xf32, #tpu.memory_space<vmem>>, %arg2: memref<8x16xf32, #tpu.memory_space<vmem>>) attributes {dimension_semantics = [], scalar_prefetch = 0 : i64, scratch_operands = 0 : i64, tpu.core_type = #tpu.core_type<tc>} {
    %c0 = arith.constant 0 : index
    %c0_0 = arith.constant 0 : index
    %0 = vector.load %arg0[%c0, %c0_0] : memref<8x16xf32, #tpu.memory_space<vmem>>, vector<8x16xf32>
    %1 = vector.extract_strided_slice %0 {offsets = [0, 0], sizes = [8, 8], strides = [1, 1]} : vector<8x16xf32> to vector<8x8xf32>
    %2 = vector.extract_strided_slice %0 {offsets = [0, 8], sizes = [8, 8], strides = [1, 1]} : vector<8x16xf32> to vector<8x8xf32>
    %c0_1 = arith.constant 0 : index
    %c0_2 = arith.constant 0 : index
    %3 = vector.load %arg1[%c0_1, %c0_2] : memref<68x8xf32, #tpu.memory_space<vmem>>, vector<8x8xf32>
    %c56 = arith.constant 56 : index
    %c0_3 = arith.constant 0 : index
    %4 = vector.load %arg1[%c56, %c0_3] : memref<68x8xf32, #tpu.memory_space<vmem>>, vector<1x8xf32>
    %c61 = arith.constant 61 : index
    %c0_4 = arith.constant 0 : index
    %5 = vector.load %arg1[%c61, %c0_4] : memref<68x8xf32, #tpu.memory_space<vmem>>, vector<1x8xf32>
    %cst = arith.constant dense<0.000000e+00> : vector<8x8xf32>
    %6 = tpu.matmul %2, %3, %cst {dimension_numbers = #tpu.dot_dimension_numbers<[1], [0], [0], [1], [0, 0, 1, 1], [], []>} : vector<8x8xf32>, vector<8x8xf32>, vector<8x8xf32> -> vector<8x8xf32>
    %cst_5 = arith.constant dense<0.000000e+00> : vector<8xf32>
    %7 = vector.multi_reduction <add>, %6, %cst_5 [0] : vector<8x8xf32> to vector<8xf32>
    %8 = vector.shape_cast %7 : vector<8xf32> to vector<1x8xf32>
    %9 = arith.mulf %6, %6 : vector<8x8xf32>
    %cst_6 = arith.constant dense<0.000000e+00> : vector<8xf32>
    %10 = vector.multi_reduction <add>, %9, %cst_6 [0] : vector<8x8xf32> to vector<8xf32>
    %11 = vector.shape_cast %10 : vector<8xf32> to vector<1x8xf32>
    %cst_7 = arith.constant 1.250000e-01 : f32
    %12 = vector.broadcast %cst_7 : f32 to vector<1x8xf32>
    %13 = arith.mulf %8, %12 : vector<1x8xf32>
    %cst_8 = arith.constant 1.250000e-01 : f32
    %14 = vector.broadcast %cst_8 : f32 to vector<1x8xf32>
    %15 = arith.mulf %11, %14 : vector<1x8xf32>
    %16 = arith.mulf %13, %13 : vector<1x8xf32>
    %17 = arith.subf %15, %16 : vector<1x8xf32>
    %cst_9 = arith.constant 0.000000e+00 : f32
    %18 = vector.broadcast %cst_9 : f32 to vector<1x8xf32>
    %19 = arith.maximumf %17, %18 : vector<1x8xf32>
    %20 = vector.broadcast %13 : vector<1x8xf32> to vector<8x8xf32>
    %21 = arith.subf %6, %20 : vector<8x8xf32>
    %cst_10 = arith.constant 9.99999974E-6 : f32
    %22 = vector.broadcast %cst_10 : f32 to vector<1x8xf32>
    %23 = arith.addf %19, %22 : vector<1x8xf32>
    %24 = math.rsqrt %23 : vector<1x8xf32>
    %25 = arith.mulf %4, %24 : vector<1x8xf32>
    %26 = vector.broadcast %25 : vector<1x8xf32> to vector<8x8xf32>
    %27 = arith.mulf %21, %26 : vector<8x8xf32>
    %28 = vector.broadcast %5 : vector<1x8xf32> to vector<8x8xf32>
    %29 = arith.addf %27, %28 : vector<8x8xf32>
    %cst_11 = arith.constant 5.000000e-01 : f32
    %30 = vector.broadcast %cst_11 : f32 to vector<8x8xf32>
    %31 = arith.mulf %30, %29 : vector<8x8xf32>
    %32 = math.tanh %31 : vector<8x8xf32>
    %cst_12 = arith.constant 5.000000e-01 : f32
    %33 = vector.broadcast %cst_12 : f32 to vector<8x8xf32>
    %34 = arith.mulf %33, %32 : vector<8x8xf32>
    %cst_13 = arith.constant 5.000000e-01 : f32
    %35 = vector.broadcast %cst_13 : f32 to vector<8x8xf32>
    %36 = arith.addf %34, %35 : vector<8x8xf32>
    %c8 = arith.constant 8 : index
    %c0_14 = arith.constant 0 : index
    %37 = vector.load %arg1[%c8, %c0_14] : memref<68x8xf32, #tpu.memory_space<vmem>>, vector<8x8xf32>
    %c57 = arith.constant 57 : index
    %c0_15 = arith.constant 0 : index
    %38 = vector.load %arg1[%c57, %c0_15] : memref<68x8xf32, #tpu.memory_space<vmem>>, vector<1x8xf32>
    %c62 = arith.constant 62 : index
    %c0_16 = arith.constant 0 : index
    %39 = vector.load %arg1[%c62, %c0_16] : memref<68x8xf32, #tpu.memory_space<vmem>>, vector<1x8xf32>
    %cst_17 = arith.constant dense<0.000000e+00> : vector<8x8xf32>
    %40 = tpu.matmul %36, %37, %cst_17 {dimension_numbers = #tpu.dot_dimension_numbers<[1], [0], [0], [1], [0, 0, 1, 1], [], []>} : vector<8x8xf32>, vector<8x8xf32>, vector<8x8xf32> -> vector<8x8xf32>
    %cst_18 = arith.constant dense<0.000000e+00> : vector<8xf32>
    %41 = vector.multi_reduction <add>, %40, %cst_18 [0] : vector<8x8xf32> to vector<8xf32>
    %42 = vector.shape_cast %41 : vector<8xf32> to vector<1x8xf32>
    %43 = arith.mulf %40, %40 : vector<8x8xf32>
    %cst_19 = arith.constant dense<0.000000e+00> : vector<8xf32>
    %44 = vector.multi_reduction <add>, %43, %cst_19 [0] : vector<8x8xf32> to vector<8xf32>
    %45 = vector.shape_cast %44 : vector<8xf32> to vector<1x8xf32>
    %cst_20 = arith.constant 1.250000e-01 : f32
    %46 = vector.broadcast %cst_20 : f32 to vector<1x8xf32>
    %47 = arith.mulf %42, %46 : vector<1x8xf32>
    %cst_21 = arith.constant 1.250000e-01 : f32
    %48 = vector.broadcast %cst_21 : f32 to vector<1x8xf32>
    %49 = arith.mulf %45, %48 : vector<1x8xf32>
    %50 = arith.mulf %47, %47 : vector<1x8xf32>
    %51 = arith.subf %49, %50 : vector<1x8xf32>
    %cst_22 = arith.constant 0.000000e+00 : f32
    %52 = vector.broadcast %cst_22 : f32 to vector<1x8xf32>
    %53 = arith.maximumf %51, %52 : vector<1x8xf32>
    %54 = vector.broadcast %47 : vector<1x8xf32> to vector<8x8xf32>
    %55 = arith.subf %40, %54 : vector<8x8xf32>
    %cst_23 = arith.constant 9.99999974E-6 : f32
    %56 = vector.broadcast %cst_23 : f32 to vector<1x8xf32>
    %57 = arith.addf %53, %56 : vector<1x8xf32>
    %58 = math.rsqrt %57 : vector<1x8xf32>
    %59 = arith.mulf %38, %58 : vector<1x8xf32>
    %60 = vector.broadcast %59 : vector<1x8xf32> to vector<8x8xf32>
    %61 = arith.mulf %55, %60 : vector<8x8xf32>
    %62 = vector.broadcast %39 : vector<1x8xf32> to vector<8x8xf32>
    %63 = arith.addf %61, %62 : vector<8x8xf32>
    %cst_24 = arith.constant 5.000000e-01 : f32
    %64 = vector.broadcast %cst_24 : f32 to vector<8x8xf32>
    %65 = arith.mulf %64, %63 : vector<8x8xf32>
    %66 = math.tanh %65 : vector<8x8xf32>
    %cst_25 = arith.constant 5.000000e-01 : f32
    %67 = vector.broadcast %cst_25 : f32 to vector<8x8xf32>
    %68 = arith.mulf %67, %66 : vector<8x8xf32>
    %cst_26 = arith.constant 5.000000e-01 : f32
    %69 = vector.broadcast %cst_26 : f32 to vector<8x8xf32>
    %70 = arith.addf %68, %69 : vector<8x8xf32>
    %c16 = arith.constant 16 : index
    %c0_27 = arith.constant 0 : index
    %71 = vector.load %arg1[%c16, %c0_27] : memref<68x8xf32, #tpu.memory_space<vmem>>, vector<8x8xf32>
    %c58 = arith.constant 58 : index
    %c0_28 = arith.constant 0 : index
    %72 = vector.load %arg1[%c58, %c0_28] : memref<68x8xf32, #tpu.memory_space<vmem>>, vector<1x8xf32>
    %c63 = arith.constant 63 : index
    %c0_29 = arith.constant 0 : index
    %73 = vector.load %arg1[%c63, %c0_29] : memref<68x8xf32, #tpu.memory_space<vmem>>, vector<1x8xf32>
    %cst_30 = arith.constant dense<0.000000e+00> : vector<8x8xf32>
    %74 = tpu.matmul %70, %71, %cst_30 {dimension_numbers = #tpu.dot_dimension_numbers<[1], [0], [0], [1], [0, 0, 1, 1], [], []>} : vector<8x8xf32>, vector<8x8xf32>, vector<8x8xf32> -> vector<8x8xf32>
    %cst_31 = arith.constant dense<0.000000e+00> : vector<8xf32>
    %75 = vector.multi_reduction <add>, %74, %cst_31 [0] : vector<8x8xf32> to vector<8xf32>
    %76 = vector.shape_cast %75 : vector<8xf32> to vector<1x8xf32>
    %77 = arith.mulf %74, %74 : vector<8x8xf32>
    %cst_32 = arith.constant dense<0.000000e+00> : vector<8xf32>
    %78 = vector.multi_reduction <add>, %77, %cst_32 [0] : vector<8x8xf32> to vector<8xf32>
    %79 = vector.shape_cast %78 : vector<8xf32> to vector<1x8xf32>
    %cst_33 = arith.constant 1.250000e-01 : f32
    %80 = vector.broadcast %cst_33 : f32 to vector<1x8xf32>
    %81 = arith.mulf %76, %80 : vector<1x8xf32>
    %cst_34 = arith.constant 1.250000e-01 : f32
    %82 = vector.broadcast %cst_34 : f32 to vector<1x8xf32>
    %83 = arith.mulf %79, %82 : vector<1x8xf32>
    %84 = arith.mulf %81, %81 : vector<1x8xf32>
    %85 = arith.subf %83, %84 : vector<1x8xf32>
    %cst_35 = arith.constant 0.000000e+00 : f32
    %86 = vector.broadcast %cst_35 : f32 to vector<1x8xf32>
    %87 = arith.maximumf %85, %86 : vector<1x8xf32>
    %88 = vector.broadcast %81 : vector<1x8xf32> to vector<8x8xf32>
    %89 = arith.subf %74, %88 : vector<8x8xf32>
    %cst_36 = arith.constant 9.99999974E-6 : f32
    %90 = vector.broadcast %cst_36 : f32 to vector<1x8xf32>
    %91 = arith.addf %87, %90 : vector<1x8xf32>
    %92 = math.rsqrt %91 : vector<1x8xf32>
    %93 = arith.mulf %72, %92 : vector<1x8xf32>
    %94 = vector.broadcast %93 : vector<1x8xf32> to vector<8x8xf32>
    %95 = arith.mulf %89, %94 : vector<8x8xf32>
    %96 = vector.broadcast %73 : vector<1x8xf32> to vector<8x8xf32>
    %97 = arith.addf %95, %96 : vector<8x8xf32>
    %cst_37 = arith.constant 5.000000e-01 : f32
    %98 = vector.broadcast %cst_37 : f32 to vector<8x8xf32>
    %99 = arith.mulf %98, %97 : vector<8x8xf32>
    %100 = math.tanh %99 : vector<8x8xf32>
    %cst_38 = arith.constant 5.000000e-01 : f32
    %101 = vector.broadcast %cst_38 : f32 to vector<8x8xf32>
    %102 = arith.mulf %101, %100 : vector<8x8xf32>
    %cst_39 = arith.constant 5.000000e-01 : f32
    %103 = vector.broadcast %cst_39 : f32 to vector<8x8xf32>
    %104 = arith.addf %102, %103 : vector<8x8xf32>
    %c24 = arith.constant 24 : index
    %c0_40 = arith.constant 0 : index
    %105 = vector.load %arg1[%c24, %c0_40] : memref<68x8xf32, #tpu.memory_space<vmem>>, vector<8x8xf32>
    %c59 = arith.constant 59 : index
    %c0_41 = arith.constant 0 : index
    %106 = vector.load %arg1[%c59, %c0_41] : memref<68x8xf32, #tpu.memory_space<vmem>>, vector<1x8xf32>
    %c64 = arith.constant 64 : index
    %c0_42 = arith.constant 0 : index
    %107 = vector.load %arg1[%c64, %c0_42] : memref<68x8xf32, #tpu.memory_space<vmem>>, vector<1x8xf32>
    %cst_43 = arith.constant dense<0.000000e+00> : vector<8x8xf32>
    %108 = tpu.matmul %104, %105, %cst_43 {dimension_numbers = #tpu.dot_dimension_numbers<[1], [0], [0], [1], [0, 0, 1, 1], [], []>} : vector<8x8xf32>, vector<8x8xf32>, vector<8x8xf32> -> vector<8x8xf32>
    %cst_44 = arith.constant dense<0.000000e+00> : vector<8xf32>
    %109 = vector.multi_reduction <add>, %108, %cst_44 [0] : vector<8x8xf32> to vector<8xf32>
    %110 = vector.shape_cast %109 : vector<8xf32> to vector<1x8xf32>
    %111 = arith.mulf %108, %108 : vector<8x8xf32>
    %cst_45 = arith.constant dense<0.000000e+00> : vector<8xf32>
    %112 = vector.multi_reduction <add>, %111, %cst_45 [0] : vector<8x8xf32> to vector<8xf32>
    %113 = vector.shape_cast %112 : vector<8xf32> to vector<1x8xf32>
    %cst_46 = arith.constant 1.250000e-01 : f32
    %114 = vector.broadcast %cst_46 : f32 to vector<1x8xf32>
    %115 = arith.mulf %110, %114 : vector<1x8xf32>
    %cst_47 = arith.constant 1.250000e-01 : f32
    %116 = vector.broadcast %cst_47 : f32 to vector<1x8xf32>
    %117 = arith.mulf %113, %116 : vector<1x8xf32>
    %118 = arith.mulf %115, %115 : vector<1x8xf32>
    %119 = arith.subf %117, %118 : vector<1x8xf32>
    %cst_48 = arith.constant 0.000000e+00 : f32
    %120 = vector.broadcast %cst_48 : f32 to vector<1x8xf32>
    %121 = arith.maximumf %119, %120 : vector<1x8xf32>
    %122 = vector.broadcast %115 : vector<1x8xf32> to vector<8x8xf32>
    %123 = arith.subf %108, %122 : vector<8x8xf32>
    %cst_49 = arith.constant 9.99999974E-6 : f32
    %124 = vector.broadcast %cst_49 : f32 to vector<1x8xf32>
    %125 = arith.addf %121, %124 : vector<1x8xf32>
    %126 = math.rsqrt %125 : vector<1x8xf32>
    %127 = arith.mulf %106, %126 : vector<1x8xf32>
    %128 = vector.broadcast %127 : vector<1x8xf32> to vector<8x8xf32>
    %129 = arith.mulf %123, %128 : vector<8x8xf32>
    %130 = vector.broadcast %107 : vector<1x8xf32> to vector<8x8xf32>
    %131 = arith.addf %129, %130 : vector<8x8xf32>
    %cst_50 = arith.constant 5.000000e-01 : f32
    %132 = vector.broadcast %cst_50 : f32 to vector<8x8xf32>
    %133 = arith.mulf %132, %131 : vector<8x8xf32>
    %134 = math.tanh %133 : vector<8x8xf32>
    %cst_51 = arith.constant 5.000000e-01 : f32
    %135 = vector.broadcast %cst_51 : f32 to vector<8x8xf32>
    %136 = arith.mulf %135, %134 : vector<8x8xf32>
    %cst_52 = arith.constant 5.000000e-01 : f32
    %137 = vector.broadcast %cst_52 : f32 to vector<8x8xf32>
    %138 = arith.addf %136, %137 : vector<8x8xf32>
    %c32 = arith.constant 32 : index
    %c0_53 = arith.constant 0 : index
    %139 = vector.load %arg1[%c32, %c0_53] : memref<68x8xf32, #tpu.memory_space<vmem>>, vector<8x8xf32>
    %c60 = arith.constant 60 : index
    %c0_54 = arith.constant 0 : index
    %140 = vector.load %arg1[%c60, %c0_54] : memref<68x8xf32, #tpu.memory_space<vmem>>, vector<1x8xf32>
    %c65 = arith.constant 65 : index
    %c0_55 = arith.constant 0 : index
    %141 = vector.load %arg1[%c65, %c0_55] : memref<68x8xf32, #tpu.memory_space<vmem>>, vector<1x8xf32>
    %cst_56 = arith.constant dense<0.000000e+00> : vector<8x8xf32>
    %142 = tpu.matmul %138, %139, %cst_56 {dimension_numbers = #tpu.dot_dimension_numbers<[1], [0], [0], [1], [0, 0, 1, 1], [], []>} : vector<8x8xf32>, vector<8x8xf32>, vector<8x8xf32> -> vector<8x8xf32>
    %cst_57 = arith.constant dense<0.000000e+00> : vector<8xf32>
    %143 = vector.multi_reduction <add>, %142, %cst_57 [0] : vector<8x8xf32> to vector<8xf32>
    %144 = vector.shape_cast %143 : vector<8xf32> to vector<1x8xf32>
    %145 = arith.mulf %142, %142 : vector<8x8xf32>
    %cst_58 = arith.constant dense<0.000000e+00> : vector<8xf32>
    %146 = vector.multi_reduction <add>, %145, %cst_58 [0] : vector<8x8xf32> to vector<8xf32>
    %147 = vector.shape_cast %146 : vector<8xf32> to vector<1x8xf32>
    %cst_59 = arith.constant 1.250000e-01 : f32
    %148 = vector.broadcast %cst_59 : f32 to vector<1x8xf32>
    %149 = arith.mulf %144, %148 : vector<1x8xf32>
    %cst_60 = arith.constant 1.250000e-01 : f32
    %150 = vector.broadcast %cst_60 : f32 to vector<1x8xf32>
    %151 = arith.mulf %147, %150 : vector<1x8xf32>
    %152 = arith.mulf %149, %149 : vector<1x8xf32>
    %153 = arith.subf %151, %152 : vector<1x8xf32>
    %cst_61 = arith.constant 0.000000e+00 : f32
    %154 = vector.broadcast %cst_61 : f32 to vector<1x8xf32>
    %155 = arith.maximumf %153, %154 : vector<1x8xf32>
    %156 = vector.broadcast %149 : vector<1x8xf32> to vector<8x8xf32>
    %157 = arith.subf %142, %156 : vector<8x8xf32>
    %cst_62 = arith.constant 9.99999974E-6 : f32
    %158 = vector.broadcast %cst_62 : f32 to vector<1x8xf32>
    %159 = arith.addf %155, %158 : vector<1x8xf32>
    %160 = math.rsqrt %159 : vector<1x8xf32>
    %161 = arith.mulf %140, %160 : vector<1x8xf32>
    %162 = vector.broadcast %161 : vector<1x8xf32> to vector<8x8xf32>
    %163 = arith.mulf %157, %162 : vector<8x8xf32>
    %164 = vector.broadcast %141 : vector<1x8xf32> to vector<8x8xf32>
    %165 = arith.addf %163, %164 : vector<8x8xf32>
    %cst_63 = arith.constant 5.000000e-01 : f32
    %166 = vector.broadcast %cst_63 : f32 to vector<8x8xf32>
    %167 = arith.mulf %166, %165 : vector<8x8xf32>
    %168 = math.tanh %167 : vector<8x8xf32>
    %cst_64 = arith.constant 5.000000e-01 : f32
    %169 = vector.broadcast %cst_64 : f32 to vector<8x8xf32>
    %170 = arith.mulf %169, %168 : vector<8x8xf32>
    %cst_65 = arith.constant 5.000000e-01 : f32
    %171 = vector.broadcast %cst_65 : f32 to vector<8x8xf32>
    %172 = arith.addf %170, %171 : vector<8x8xf32>
    %c40 = arith.constant 40 : index
    %c0_66 = arith.constant 0 : index
    %173 = vector.load %arg1[%c40, %c0_66] : memref<68x8xf32, #tpu.memory_space<vmem>>, vector<8x8xf32>
    %c48 = arith.constant 48 : index
    %c0_67 = arith.constant 0 : index
    %174 = vector.load %arg1[%c48, %c0_67] : memref<68x8xf32, #tpu.memory_space<vmem>>, vector<8x8xf32>
    %c66 = arith.constant 66 : index
    %c0_68 = arith.constant 0 : index
    %175 = vector.load %arg1[%c66, %c0_68] : memref<68x8xf32, #tpu.memory_space<vmem>>, vector<1x8xf32>
    %c67 = arith.constant 67 : index
    %c0_69 = arith.constant 0 : index
    %176 = vector.load %arg1[%c67, %c0_69] : memref<68x8xf32, #tpu.memory_space<vmem>>, vector<1x8xf32>
    %cst_70 = arith.constant dense<0.000000e+00> : vector<8x8xf32>
    %177 = tpu.matmul %172, %173, %cst_70 {dimension_numbers = #tpu.dot_dimension_numbers<[1], [0], [0], [1], [0, 0, 1, 1], [], []>} : vector<8x8xf32>, vector<8x8xf32>, vector<8x8xf32> -> vector<8x8xf32>
    %178 = vector.broadcast %175 : vector<1x8xf32> to vector<8x8xf32>
    %179 = arith.addf %177, %178 : vector<8x8xf32>
    %cst_71 = arith.constant dense<0.000000e+00> : vector<8x8xf32>
    %180 = tpu.matmul %172, %174, %cst_71 {dimension_numbers = #tpu.dot_dimension_numbers<[1], [0], [0], [1], [0, 0, 1, 1], [], []>} : vector<8x8xf32>, vector<8x8xf32>, vector<8x8xf32> -> vector<8x8xf32>
    %181 = vector.broadcast %176 : vector<1x8xf32> to vector<8x8xf32>
    %182 = arith.addf %180, %181 : vector<8x8xf32>
    %183 = math.exp %179 : vector<8x8xf32>
    %184 = arith.mulf %183, %1 : vector<8x8xf32>
    %185 = arith.addf %184, %182 : vector<8x8xf32>
    %186 = tpu.concatenate %185, %2 in 1 : vector<8x8xf32>, vector<8x8xf32> -> vector<8x16xf32>
    %c0_72 = arith.constant 0 : index
    %c0_73 = arith.constant 0 : index
    %187 = vector.load %arg2[%c0_72, %c0_73] : memref<8x16xf32, #tpu.memory_space<vmem>>, vector<8x16xf32>
    tpu.vector_store %arg2[%c0_72, %c0_73], %186 {strides = array<i32>} : memref<8x16xf32, #tpu.memory_space<vmem>>, vector<8x16xf32>,
    return
  }
}

</mosaic_0001>

<bundles_post_ra>
// kernel: affine_coupling_forward.1
= control target key start
LH: loop header
LB: loop body
LE: loop exit
PB: predicated region body
PF: predicated region fallthrough
CT: control target
= control target key end

     0   :  { %s875_s13 = smov 120   ;;  %v876_v2 = vmov 0.0   ;;  %s1017_s0 = inlined_call_operand.vmem [shape: f32[8,16], index: 0, kind: input, shape index: {}]   ;;  %s1018_s1 = inlined_call_operand.vmem [shape: f32[68,8], index: 1, kind: input, shape index: {}]   ;;  %s1019_s2 = inlined_call_operand.hbm [shape: f32[8,16], index: 2, kind: output, shape index: {}]  }
   0x1   :  { %v897_v0 = vld [vmem:[%s1017_s0] sm:$0xff]  ;;  %790 = vmatprep.subr.mxu0 %v876_v2 }
   0x2   :  { %v13_v1 = vld [vmem:[%s1018_s1] sm:$0xff]  ;;  %17 = vrot.lane.b32.xlu0 %v897_v0, %s875_s13 }
   0x3   :  { %7 = vsyncpa [#allocation3], 0  ;;  %791 = vmatpush3.msra.mxu0 %v13_v1  ;;  %vm877_vm0 = vmmov 0   ;;  %795 = vmatprep.subr.mxu1 %v876_v2  ;;  %vm19_vm1 = vcmask 64512   ;;  %v130_v4 = vld [vmem:[%s1018_s1 + $0x8] sm:$0xff]  ;;  %v116_v28 = vlaneseq  ;;  %v244_v43 = vld [vmem:[%s1018_s1 + $0x10] sm:$0xff] }
   0x4   :  { %792 = vmatprep.mubr.msk.f32.mxu0 %vm877_vm0, %v876_v2  ;;  %797 = vmatprep.mubr.msk.f32.mxu1 %vm877_vm0, %v876_v2  ;;  %v14_v30 = vld [vmem:[%s1018_s1 + $0x38] sm:$0x1]  ;;  %v763_v36 = vld [vmem:[%s1018_s1 + $0x3d] ss:$0 sm:$0xff]  ;;  %s878_s20 = smov [#allocation2]   ;;  %vm746_vm2 = vcmask 130048  }
   0x5   :  { %800 = vmatprep.subr.mxu0 %v876_v2  ;;  %796 = vmatpush3.msra.mxu1 %v130_v4  ;;  %v117_v29 = vshrl.u32 %v116_v28, 7  ;;  %s754_s21 = sshll.u32 %s878_s20, 4  ;;  %s755_s21 = int_to_ptr.vmem [resolvable:$true] %s754_s21 }
   0x6   :  { %805 = vmatprep.subr.mxu1 %v876_v2  ;;  %s851_s22 = scalar_lea.vmem %s755_s21, 128  ;;  %p856_p1 = scmp.lt.s32.totalorder %s755_s21, %s755_s21 }
   0x7   :  { %v922_v31 = vsub.s32 0, %v117_v29  ;;  %p852_p0 = scmp.ne.s32.totalorder %s755_s21, %s851_s22  ;;  %p857_p2 = scmp.lt.s32.totalorder %s851_s22, %s851_s22 }
   0x9   :  { %p858_p3 = por %p857_p2, %p856_p1 }
   0xb   :  { %p859_p4 = pnand %p858_p3, %p852_p0 }
  0x74   :  { %v18_v3 = vpop.permute.xlu0 %17 }
  0x75   :  { %793 = vmatmul.mubr.msk.f32.vlgmr.msra.gmra.mrb[0].mxu0 %vm19_vm1, %v18_v3 }
  0x76   :  { %802 = vmatprep.mubr.msk.f32.mxu0 %vm877_vm0, %v876_v2  ;;  %801 = vmatpush3.msra.mxu0 %v244_v43 }
  0x77   :  { %810 = vmatprep.subr.mxu0 %v876_v2 }
 0x148   :  { %v88_v5 = vpop.f32.mrb[0].mxu0 }
 0x149   :  { %v92_v6 = vsel %vm19_vm1, %v88_v5, 0.0  ;;  %v99_v7 = vmul.f32 %v88_v5, %v88_v5  ;;  %v794_v8 = vpop.f32.mrb[1].mxu0 }
 0x14a   :  { %v93_v9 = vrot.slane %v92_v6, 4 }
 0x14b   :  { %v100_v10 = vsel %vm19_vm1, %v99_v7, 0.0 }
 0x14c   :  { %v94_v11 = vadd.f32 %v93_v9, %v92_v6  ;;  %v101_v12 = vrot.slane %v100_v10, 4 }
 0x14e   :  { %v95_v13 = vrot.slane %v94_v11, 2  ;;  %v102_v14 = vadd.f32 %v101_v12, %v100_v10  ;;  %v765_v10 = vld [vmem:[%s1018_s1 + $0x3e] ss:$0 sm:$0xff] }
 0x150   :  { %v96_v15 = vadd.f32 %v95_v13, %v94_v11  ;;  %v103_v16 = vrot.slane %v102_v14, 2 }
 0x152   :  { %v97_v17 = vrot.slane %v96_v15, 1  ;;  %v104_v18 = vadd.f32 %v103_v16, %v102_v14 }
 0x154   :  { %v98_v19 = vadd.f32 %v97_v17, %v96_v15  ;;  %v105_v20 = vrot.slane %v104_v18, 1  ;;  %v358_v17 = vld [vmem:[%s1018_s1 + $0x18] sm:$0xff] }
 0x156   :  { %v106_v21 = vadd.f32 %v105_v20, %v104_v18  ;;  %v107_v22 = vmul.f32 0.125, %v98_v19 }
 0x158   :  { %v108_v23 = vmul.f32 0.125, %v106_v21  ;;  %v109_v24 = vmul.f32 %v107_v22, %v107_v22  ;;  %v112_v34 = vsub.f32 %v88_v5, %v107_v22  ;;  %v131_v5 = vld [vmem:[%s1018_s1 + $0x39] sm:$0x1] }
 0x15a   :  { %v110_v25 = vsub.f32 %v108_v23, %v109_v24 }
 0x15c   :  { %v111_v26 = vmax.f32 %v110_v25, 0.0 }
 0x15e   :  { %v113_v27 = vadd.f32 1e-05, %v111_v26 }
 0x160   :  { %829 = vrsqrt.f32 %v113_v27 }
 0x16a   :  { %v830_v32 = vpop.eup %829 }
 0x16b   :  { %v115_v33 = vmul.f32 %v830_v32, %v14_v30 }
 0x16d   :  { %v119_v35 = vrot.slane %v115_v33, %v922_v31 }
 0x16f   :  { %v120_v37 = vmul.f32 %v119_v35, %v112_v34 }
 0x171   :  { %v125_v38 = vadd.f32 %v763_v36, %v120_v37 }
 0x173   :  { %v126_v39 = vmul.f32 0.5, %v125_v38 }
 0x175   :  { %831 = vtanh.f32 %v126_v39 }
 0x17f   :  { %v832_v40 = vpop.eup %831 }
 0x180   :  { %v128_v41 = vmul.f32 0.5, %v832_v40 }
 0x182   :  { %v129_v42 = vadd.f32 0.5, %v128_v41 }
 0x184   :  { %798 = vmatmul.mubr.msk.f32.vlgmr.msra.gmra.mrb[0].mxu1 %vm19_vm1, %v129_v42  ;;  %v245_v42 = vld [vmem:[%s1018_s1 + $0x3a] sm:$0x1] }
 0x185   :  { %807 = vmatprep.mubr.msk.f32.mxu1 %vm877_vm0, %v876_v2  ;;  %806 = vmatpush3.msra.mxu1 %v358_v17 }
 0x186   :  { %815 = vmatprep.subr.mxu1 %v876_v2 }
 0x257   :  { %v202_v44 = vpop.f32.mrb[0].mxu1 }
 0x258   :  { %v206_v45 = vsel %vm19_vm1, %v202_v44, 0.0  ;;  %v213_v46 = vmul.f32 %v202_v44, %v202_v44  ;;  %v799_v47 = vpop.f32.mrb[1].mxu1 }
 0x259   :  { %v207_v48 = vrot.slane %v206_v45, 4  ;;  %v767_v47 = vld [vmem:[%s1018_s1 + $0x3f] ss:$0 sm:$0xff] }
 0x25a   :  { %v214_v49 = vsel %vm19_vm1, %v213_v46, 0.0 }
 0x25b   :  { %v208_v50 = vadd.f32 %v207_v48, %v206_v45  ;;  %v215_v51 = vrot.slane %v214_v49, 4 }
 0x25d   :  { %v209_v52 = vrot.slane %v208_v50, 2  ;;  %v216_v53 = vadd.f32 %v215_v51, %v214_v49 }
 0x25f   :  { %v210_v54 = vadd.f32 %v209_v52, %v208_v50  ;;  %v217_v55 = vrot.slane %v216_v53, 2 }
 0x261   :  { %v211_v56 = vrot.slane %v210_v54, 1  ;;  %v218_v57 = vadd.f32 %v217_v55, %v216_v53 }
 0x263   :  { %v212_v58 = vadd.f32 %v211_v56, %v210_v54  ;;  %v219_v59 = vrot.slane %v218_v57, 1  ;;  %v472_v54 = vld [vmem:[%s1018_s1 + $0x20] sm:$0xff] }
 0x265   :  { %v220_v60 = vadd.f32 %v219_v59, %v218_v57  ;;  %v221_v61 = vmul.f32 0.125, %v212_v58 }
 0x267   :  { %v222_v62 = vmul.f32 0.125, %v220_v60  ;;  %v223_v63 = vmul.f32 %v221_v61, %v221_v61  ;;  %v226_v8 = vsub.f32 %v202_v44, %v221_v61 }
 0x269   :  { %v224_v1 = vsub.f32 %v222_v62, %v223_v63 }
 0x26b   :  { %v225_v3 = vmax.f32 %v224_v1, 0.0 }
 0x26d   :  { %v227_v4 = vadd.f32 1e-05, %v225_v3 }
 0x26f   :  { %833 = vrsqrt.f32 %v227_v4 }
 0x279   :  { %v834_v6 = vpop.eup %833 }
 0x27a   :  { %v229_v7 = vmul.f32 %v834_v6, %v131_v5 }
 0x27c   :  { %v233_v9 = vrot.slane %v229_v7, %v922_v31 }
 0x27e   :  { %v234_v11 = vmul.f32 %v233_v9, %v226_v8 }
 0x280   :  { %v239_v12 = vadd.f32 %v765_v10, %v234_v11 }
 0x282   :  { %v240_v13 = vmul.f32 0.5, %v239_v12 }
 0x284   :  { %835 = vtanh.f32 %v240_v13 }
 0x28e   :  { %v836_v14 = vpop.eup %835 }
 0x28f   :  { %v242_v15 = vmul.f32 0.5, %v836_v14 }
 0x291   :  { %v243_v16 = vadd.f32 0.5, %v242_v15 }
 0x293   :  { %803 = vmatmul.mubr.msk.f32.vlgmr.msra.gmra.mrb[2].mxu0 %vm19_vm1, %v243_v16  ;;  %v359_v16 = vld [vmem:[%s1018_s1 + $0x3b] sm:$0x1] }
 0x294   :  { %812 = vmatprep.mubr.msk.f32.mxu0 %vm877_vm0, %v876_v2  ;;  %811 = vmatpush3.msra.mxu0 %v472_v54 }
 0x295   :  { %820 = vmatprep.subr.mxu0 %v876_v2 }
 0x366   :  { %v316_v18 = vpop.f32.mrb[2].mxu0 }
 0x367   :  { %v320_v19 = vsel %vm19_vm1, %v316_v18, 0.0  ;;  %v327_v20 = vmul.f32 %v316_v18, %v316_v18  ;;  %v804_v21 = vpop.f32.mrb[3].mxu0 }
 0x368   :  { %v321_v22 = vrot.slane %v320_v19, 4  ;;  %v769_v21 = vld [vmem:[%s1018_s1 + $0x40] ss:$0 sm:$0xff] }
 0x369   :  { %v328_v23 = vsel %vm19_vm1, %v327_v20, 0.0 }
 0x36a   :  { %v322_v24 = vadd.f32 %v321_v22, %v320_v19  ;;  %v329_v25 = vrot.slane %v328_v23, 4 }
 0x36c   :  { %v323_v26 = vrot.slane %v322_v24, 2  ;;  %v330_v27 = vadd.f32 %v329_v25, %v328_v23 }
 0x36e   :  { %v324_v28 = vadd.f32 %v323_v26, %v322_v24  ;;  %v331_v29 = vrot.slane %v330_v27, 2 }
 0x370   :  { %v325_v30 = vrot.slane %v324_v28, 1  ;;  %v332_v32 = vadd.f32 %v331_v29, %v330_v27  ;;  %v587_v29 = vld [vmem:[%s1018_s1 + $0x30] sm:$0xff] }
 0x372   :  { %v326_v33 = vadd.f32 %v325_v30, %v324_v28  ;;  %v333_v34 = vrot.slane %v332_v32, 1  ;;  %v586_v28 = vld [vmem:[%s1018_s1 + $0x28] sm:$0xff] }
 0x374   :  { %v334_v35 = vadd.f32 %v333_v34, %v332_v32  ;;  %v335_v36 = vmul.f32 0.125, %v326_v33 }
 0x376   :  { %v336_v37 = vmul.f32 0.125, %v334_v35  ;;  %v337_v38 = vmul.f32 %v335_v36, %v335_v36  ;;  %v340_v45 = vsub.f32 %v316_v18, %v335_v36 }
 0x378   :  { %v338_v39 = vsub.f32 %v336_v37, %v337_v38 }
 0x37a   :  { %v339_v40 = vmax.f32 %v338_v39, 0.0 }
 0x37c   :  { %v341_v41 = vadd.f32 1e-05, %v339_v40 }
 0x37e   :  { %837 = vrsqrt.f32 %v341_v41 }
 0x388   :  { %v838_v43 = vpop.eup %837 }
 0x389   :  { %v343_v44 = vmul.f32 %v838_v43, %v245_v42 }
 0x38b   :  { %v347_v46 = vrot.slane %v343_v44, %v922_v31 }
 0x38d   :  { %v348_v48 = vmul.f32 %v347_v46, %v340_v45 }
 0x38f   :  { %v353_v49 = vadd.f32 %v767_v47, %v348_v48 }
 0x391   :  { %v354_v50 = vmul.f32 0.5, %v353_v49 }
 0x393   :  { %839 = vtanh.f32 %v354_v50 }
 0x39d   :  { %v840_v51 = vpop.eup %839 }
 0x39e   :  { %v356_v52 = vmul.f32 0.5, %v840_v51 }
 0x3a0   :  { %v357_v53 = vadd.f32 0.5, %v356_v52 }
 0x3a2   :  { %808 = vmatmul.mubr.msk.f32.vlgmr.msra.gmra.mrb[2].mxu1 %vm19_vm1, %v357_v53  ;;  %v473_v53 = vld [vmem:[%s1018_s1 + $0x3c] sm:$0x1] }
 0x3a3   :  { %817 = vmatprep.mubr.msk.f32.mxu1 %vm877_vm0, %v876_v2  ;;  %816 = vmatpush3.msra.mxu1 %v586_v28 }
 0x475   :  { %v430_v55 = vpop.f32.mrb[2].mxu1 }
 0x476   :  { %v434_v56 = vsel %vm19_vm1, %v430_v55, 0.0  ;;  %v441_v57 = vmul.f32 %v430_v55, %v430_v55  ;;  %v809_v58 = vpop.f32.mrb[3].mxu1 }
 0x477   :  { %v435_v59 = vrot.slane %v434_v56, 4  ;;  %v771_v58 = vld [vmem:[%s1018_s1 + $0x41] ss:$0 sm:$0xff] }
 0x478   :  { %v442_v60 = vsel %vm19_vm1, %v441_v57, 0.0 }
 0x479   :  { %v436_v61 = vadd.f32 %v435_v59, %v434_v56  ;;  %v443_v62 = vrot.slane %v442_v60, 4 }
 0x47b   :  { %v437_v63 = vrot.slane %v436_v61, 2  ;;  %v444_v1 = vadd.f32 %v443_v62, %v442_v60 }
 0x47d   :  { %v438_v3 = vadd.f32 %v437_v63, %v436_v61  ;;  %v445_v4 = vrot.slane %v444_v1, 2 }
 0x47f   :  { %v439_v5 = vrot.slane %v438_v3, 1  ;;  %v446_v6 = vadd.f32 %v445_v4, %v444_v1 }
 0x481   :  { %v440_v7 = vadd.f32 %v439_v5, %v438_v3  ;;  %v447_v8 = vrot.slane %v446_v6, 1  ;;  %v772_v3 = vld [vmem:[%s1018_s1 + $0x42] ss:$0 sm:$0xff] }
 0x483   :  { %v448_v9 = vadd.f32 %v447_v8, %v446_v6  ;;  %v449_v10 = vmul.f32 0.125, %v440_v7 }
 0x485   :  { %v450_v11 = vmul.f32 0.125, %v448_v9  ;;  %v451_v12 = vmul.f32 %v449_v10, %v449_v10  ;;  %v454_v19 = vsub.f32 %v430_v55, %v449_v10  ;;  %v774_v9 = vld [vmem:[%s1018_s1 + $0x43] ss:$0 sm:$0xff] }
 0x487   :  { %v452_v13 = vsub.f32 %v450_v11, %v451_v12 }
 0x489   :  { %v453_v14 = vmax.f32 %v452_v13, 0.0 }
 0x48b   :  { %v455_v15 = vadd.f32 1e-05, %v453_v14 }
 0x48d   :  { %841 = vrsqrt.f32 %v455_v15 }
 0x497   :  { %v842_v17 = vpop.eup %841 }
 0x498   :  { %v457_v18 = vmul.f32 %v842_v17, %v359_v16 }
 0x49a   :  { %v461_v20 = vrot.slane %v457_v18, %v922_v31 }
 0x49c   :  { %v462_v22 = vmul.f32 %v461_v20, %v454_v19 }
 0x49e   :  { %v467_v23 = vadd.f32 %v769_v21, %v462_v22 }
 0x4a0   :  { %v468_v24 = vmul.f32 0.5, %v467_v23 }
 0x4a2   :  { %843 = vtanh.f32 %v468_v24 }
 0x4ac   :  { %v844_v25 = vpop.eup %843 }
 0x4ad   :  { %v470_v26 = vmul.f32 0.5, %v844_v25 }
 0x4af   :  { %v471_v27 = vadd.f32 0.5, %v470_v26 }
 0x4b1   :  { %813 = vmatmul.mubr.msk.f32.vlgmr.msra.gmra.mrb[4].mxu0 %vm19_vm1, %v471_v27 }
 0x4b2   :  { %822 = vmatprep.mubr.msk.f32.mxu0 %vm877_vm0, %v876_v2  ;;  %821 = vmatpush3.msra.mxu0 %v587_v29 }
 0x584   :  { %v544_v30 = vpop.f32.mrb[4].mxu0 }
 0x585   :  { %v548_v32 = vsel %vm19_vm1, %v544_v30, 0.0  ;;  %v555_v33 = vmul.f32 %v544_v30, %v544_v30  ;;  %v814_v34 = vpop.f32.mrb[5].mxu0 }
 0x586   :  { %v549_v35 = vrot.slane %v548_v32, 4 }
 0x587   :  { %v556_v36 = vsel %vm19_vm1, %v555_v33, 0.0 }
 0x588   :  { %v550_v37 = vadd.f32 %v549_v35, %v548_v32  ;;  %v557_v2 = vrot.slane %v556_v36, 4 }
 0x58a   :  { %v551_v38 = vrot.slane %v550_v37, 2  ;;  %v558_v39 = vadd.f32 %v557_v2, %v556_v36 }
 0x58c   :  { %v552_v40 = vadd.f32 %v551_v38, %v550_v37  ;;  %v559_v41 = vrot.slane %v558_v39, 2 }
 0x58e   :  { %v553_v42 = vrot.slane %v552_v40, 1  ;;  %v560_v43 = vadd.f32 %v559_v41, %v558_v39 }
 0x590   :  { %v554_v44 = vadd.f32 %v553_v42, %v552_v40  ;;  %v561_v45 = vrot.slane %v560_v43, 1 }
 0x592   :  { %v562_v46 = vadd.f32 %v561_v45, %v560_v43  ;;  %v563_v47 = vmul.f32 0.125, %v554_v44 }
 0x594   :  { %v564_v48 = vmul.f32 0.125, %v562_v46  ;;  %v565_v49 = vmul.f32 %v563_v47, %v563_v47  ;;  %v568_v56 = vsub.f32 %v544_v30, %v563_v47 }
 0x596   :  { %v566_v50 = vsub.f32 %v564_v48, %v565_v49 }
 0x598   :  { %v567_v51 = vmax.f32 %v566_v50, 0.0 }
 0x59a   :  { %v569_v52 = vadd.f32 1e-05, %v567_v51 }
 0x59c   :  { %845 = vrsqrt.f32 %v569_v52 }
 0x5a6   :  { %v846_v54 = vpop.eup %845 }
 0x5a7   :  { %v571_v55 = vmul.f32 %v846_v54, %v473_v53 }
 0x5a9   :  { %v575_v57 = vrot.slane %v571_v55, %v922_v31 }
 0x5ab   :  { %v576_v59 = vmul.f32 %v575_v57, %v568_v56 }
 0x5ad   :  { %v581_v60 = vadd.f32 %v771_v58, %v576_v59 }
 0x5af   :  { %v582_v61 = vmul.f32 0.5, %v581_v60 }
 0x5b1   :  { %847 = vtanh.f32 %v582_v61 }
 0x5bb   :  { %v848_v62 = vpop.eup %847 }
 0x5bc   :  { %v584_v63 = vmul.f32 0.5, %v848_v62 }
 0x5be   :  { %v585_v1 = vadd.f32 0.5, %v584_v63 }
 0x5c0   :  { %818 = vmatmul.mubr.msk.f32.vlgmr.msra.gmra.mrb[4].mxu1 %vm19_vm1, %v585_v1  ;;  %823 = vmatmul.mubr.msk.f32.vlgmr.msra.gmra.mrb[6].mxu0 %vm19_vm1, %v585_v1 }
 0x693   :  { %v663_v31 = vpop.f32.mrb[4].mxu1  ;;  %v737_v4 = vpop.f32.mrb[6].mxu0 }
 0x694   :  { %v664_v5 = vadd.f32 %v772_v3, %v663_v31  ;;  %v819_v6 = vpop.f32.mrb[5].mxu1  ;;  %v824_v7 = vpop.f32.mrb[7].mxu0  ;;  %v738_v11 = vadd.f32 %v774_v9, %v737_v4 }
 0x696   :  { %v741_v8 = vmul.f32 1.442695, %v664_v5 }
 0x698   :  { %849 = vpow2.f32 %v741_v8 }
 0x6a2   :  { %v850_v10 = vpop.eup %849 }
 0x6a3   :  { %v743_v12 = vmul.f32 %v850_v10, %v897_v0 }
 0x6a5   :  { %v744_v13 = vadd.f32 %v743_v12, %v738_v11 }
 0x6a7   :  { %v745_v14 = vsel %vm19_vm1, %v744_v13, %v897_v0 }
 0x6a8   :  { %747 = vst.msk [vmem:[#allocation2] sm:$0xff] %vm746_vm2, %v745_v14 }
 0x6a9   :  { %862 = shalt.err (!%p859_p4)
}
 0x6aa   :  { %s863_s24 = scalar_lea.hbm %s1019_s2, 128 }
 0x6ab   :  { %p864_p5 = scmp.ne.s32.totalorder %s1019_s2, %s863_s24  ;;  %p867_p6 = scmp.lt.u32.totalorder %s863_s24, %s1019_s2 }
 0x6ad   :  { %p869_p7 = pnand %p867_p6, %p864_p5 }
 0x6af   :  { %872 = shalt.err (!%p869_p7)
}
 0x6b0   :  { %757 = dma.vmem_to_hbm [thread:$0]  %s755_s21, 128, %s1019_s2, [#allocation3]  }
 0x6b1   :  { %873 = dma.done.wait [#allocation3], 128  }
 0x6b2   :  { %874 = vsyncadd [#allocation3], 4294967168 }
 0x6b3   :  { %761 = vsyncpa [#allocation3], 1 }

</bundles_post_ra>
